<compile_context>
chip_gen: v5e
topology: v5e:2x2
jax: 0.10.0
libtpu: 0.0.40
codegen_flags: <defaults>
</compile_context>

<pallas_src>
import functools

import jax
import jax.numpy as jnp
from jax import lax
from jax.experimental import pallas as pl
from jax.experimental.pallas import tpu as pltpu


def _cdiv(a, b):
    return -(-a // b)


def _round_up(a, b):
    return _cdiv(a, b) * b


def _segment_sum_kernel(num_graphs, tile_rows, chunk_rows, unroll,
                        masked_ref, batch_ref, out_ref):
    """Per-graph partial sums for one lane-dense edge tile.

    masked_ref: [tile_rows, 128] f32  predicted-edge lengths (0 where not pred)
    batch_ref:  [tile_rows, 128] i32  edge -> graph id
    out_ref:    [G, chunk_rows, 128] f32 per-split per-graph partial sums;
                the block index depends only on the outer ("parallel") grid
                axis, so it is revisited across the inner axis and acts as the
                accumulator (no extra VMEM scratch needed).
    """
    i = pl.program_id(1)  # tile index within this split (reduction axis)

    @pl.when(i == 0)
    def _init():
        out_ref[...] = jnp.zeros_like(out_ref)

    num_chunks = tile_rows // chunk_rows

    def chunk_body(k, accs):
        r0 = pl.multiple_of(k * chunk_rows, chunk_rows)
        m = masked_ref[pl.ds(r0, chunk_rows), :]   # [CH, 128] f32
        b = batch_ref[pl.ds(r0, chunk_rows), :]    # [CH, 128] i32
        # Graph-major scatter: one whole-chunk compare + select + add per
        # graph (pure VPU work on full vregs; the mask is already folded into
        # `masked`, so no extra select per graph).
        return tuple(acc + jnp.where(b == g, m, 0.0)
                     for g, acc in enumerate(accs))

    init = tuple(jnp.zeros((chunk_rows, 128), jnp.float32)
                 for _ in range(num_graphs))
    accs = lax.fori_loop(0, num_chunks, chunk_body, init, unroll=unroll)

    # Fold this tile's vreg accumulators into the resident output block
    # (one load+add+store per graph per grid step -- negligible).
    for g in range(num_graphs):
        out_ref[g, :, :] = out_ref[g, :, :] + accs[g]


@functools.partial(
    jax.jit,
    static_argnames=("loss_weight", "tile_rows", "chunk_rows", "num_splits",
                     "unroll"))
def length_loss(edge_logits, edge_attr, edge_batch, route_len, *,
                loss_weight=1.0, tile_rows=2048, chunk_rows=16, num_splits=2,
                unroll=4):
    """edge_logits: [E, C] f32, edge_attr: [E] f32, edge_batch: [E] i32,
    route_len: [G] f32 -> scalar f32 loss.

    tile_rows * 128 edges are streamed per grid step (8 B/edge -> ~2 MiB/step
    at the default 2048; double-buffered VMEM ~4 MiB, inside the scoped-VMEM
    defaults on v5e/v6e/v7x).  num_splits=2 shards edge tiles across the two
    v7x TensorCores; it is a harmless sequential loop on v5e/v6e.
    chunk_rows bounds vreg pressure (G * chunk_rows/8 accumulator vregs).
    """
    E = edge_logits.shape[0]
    G = int(route_len.shape[0])

    # ---- (1) fused XLA elementwise pass in the natural [E, C] layout -------
    # pred_edge_lengths = where(argmax(logits, 1) == 1, edge_attr, 0)
    pred = jnp.argmax(edge_logits, axis=1) == 1
    masked = jnp.where(pred, edge_attr.astype(jnp.float32), jnp.float32(0.0))

    # ---- (2) geometry: lane-dense [rows, 128], exactly-dividing grid -------
    chunk_rows = max(8, (int(chunk_rows) // 8) * 8)
    if G > 16:
        chunk_rows = 8  # keep the G * chunk_rows/8 vreg accumulators small
        # TODO(synk): for G well beyond ~16 switch the scatter to an MXU
        # one-hot contraction instead of the per-graph VPU select/add loop.
    num_splits = max(1, int(num_splits))
    rows_raw = _cdiv(E, 128)
    tile_rows = max(chunk_rows, (int(tile_rows) // chunk_rows) * chunk_rows)
    tiles_per_split = max(1, _cdiv(rows_raw, num_splits * tile_rows))
    # Shrink the tile so the padded row count overshoots by < chunk_rows per
    # tile (never exceeds the requested tile_rows -> VMEM bound holds).
    tile_rows = max(chunk_rows,
                    _round_up(_cdiv(rows_raw, num_splits * tiles_per_split),
                              chunk_rows))
    rows = num_splits * tiles_per_split * tile_rows
    e_pad = rows * 128
    num_chunks = tile_rows // chunk_rows
    unroll = max(1, min(int(unroll), num_chunks))

    # Zero padding is neutral: padded masked lengths are 0, so padded edges
    # (graph id 0 after padding) contribute nothing to any per-graph sum.
    # The `masked` pad fuses into its producer; `batch` needs one small pass.
    masked2d = jnp.pad(masked, (0, e_pad - E)).reshape(rows, 128)
    batch2d = jnp.pad(edge_batch.astype(jnp.int32),
                      (0, e_pad - E)).reshape(rows, 128)

    kernel = functools.partial(_segment_sum_kernel, G, tile_rows, chunk_rows,
                               unroll)

    flops = 4 * rows * 128 * G
    bytes_accessed = (masked2d.size + batch2d.size
                      + num_splits * G * chunk_rows * 128) * 4

    partials = pl.pallas_call(
        kernel,
        out_shape=jax.ShapeDtypeStruct((num_splits * G, chunk_rows, 128),
                                       jnp.float32),
        grid_spec=pltpu.PrefetchScalarGridSpec(
            num_scalar_prefetch=0,
            grid=(num_splits, tiles_per_split),
            in_specs=[
                pl.BlockSpec((tile_rows, 128),
                             lambda c, i: (c * tiles_per_split + i, 0)),
                pl.BlockSpec((tile_rows, 128),
                             lambda c, i: (c * tiles_per_split + i, 0)),
            ],
            # One [G, chunk_rows, 128] partial-sum block per split; constant
            # across the inner axis -> resident accumulator.
            out_specs=pl.BlockSpec((G, chunk_rows, 128),
                                   lambda c, i: (c, 0, 0)),
        ),
        compiler_params=pltpu.CompilerParams(
            dimension_semantics=("parallel", "arbitrary")),
        cost_estimate=pl.CostEstimate(flops=flops, transcendentals=0,
                                      bytes_accessed=bytes_accessed),
    )(masked2d, batch2d)
    # (If a profile ever shows exposed DMA on the masked stream at large tiles,
    #  add pipeline_mode=pl.Buffered(3) to its BlockSpec.)

    # ---- (3) tiny XLA epilogue: combine per-TensorCore partials + MSE -------
    per_graph = jnp.sum(partials.reshape(num_splits, G, -1), axis=(0, 2))  # [G]
    diff = per_graph - route_len.astype(jnp.float32)
    return loss_weight * jnp.mean(diff * diff)


def _reference(edge_logits, edge_attr, edge_batch, route_len, loss_weight=1.0):
    pred = jnp.argmax(edge_logits, axis=1) == 1
    masked = jnp.where(pred, edge_attr, 0.0)
    per_graph = jax.ops.segment_sum(masked, edge_batch,
                                    num_segments=route_len.shape[0])
    return loss_weight * jnp.mean((per_graph - route_len) ** 2)


if __name__ == "__main__":
    key = jax.random.PRNGKey(0)
    k1, k2, k3, k4 = jax.random.split(key, 4)

    E, C, G = 2065, 3, 6
    edge_logits = jax.random.normal(k1, (E, C), dtype=jnp.float32)
    edge_attr = jax.random.uniform(k2, (E,), dtype=jnp.float32,
                                   minval=0.5, maxval=2.0)
    edge_batch = jax.random.randint(k3, (E,), 0, G, dtype=jnp.int32)
    route_len = jax.random.uniform(k4, (G,), dtype=jnp.float32,
                                   minval=50.0, maxval=200.0)

    ref = _reference(edge_logits, edge_attr, edge_batch, route_len,
                     loss_weight=1.0)

    # Default (production) sizing: 2048-row tiles, 2-way TensorCore split.
    loss = length_loss(edge_logits, edge_attr, edge_batch, route_len,
                       loss_weight=1.0)
    loss = jax.block_until_ready(loss)
    assert jnp.allclose(loss, ref, rtol=1e-4, atol=1e-2), (loss, ref)

    # Tiny tiles: exercises multi-tile accumulation on the inner ("arbitrary")
    # axis together with the 2-way split (uneven real work per split).
    loss2 = length_loss(edge_logits, edge_attr, edge_batch, route_len,
                        loss_weight=1.0, tile_rows=8, chunk_rows=8,
                        num_splits=2)
    loss2 = jax.block_until_ready(loss2)
    assert jnp.allclose(loss2, ref, rtol=1e-4, atol=1e-2), (loss2, ref)

    # Single-split path with in-tile chunk streaming (fori_loop, unroll=2).
    loss3 = length_loss(edge_logits, edge_attr, edge_batch, route_len,
                        loss_weight=1.0, tile_rows=16, chunk_rows=8,
                        num_splits=1, unroll=2)
    loss3 = jax.block_until_ready(loss3)
    assert jnp.allclose(loss3, ref, rtol=1e-4, atol=1e-2), (loss3, ref)

    print("KERNEL_OK")
</pallas_src>

<mosaic_0001>
module attributes {stable_mosaic.version = 11 : i64} {
  func.func @_segment_sum_kernel(%arg0: i32, %arg1: i32, %arg2: memref<16x128xf32, #tpu.memory_space<vmem>>, %arg3: memref<16x128xi32, #tpu.memory_space<vmem>>, %arg4: memref<6x16x128xf32, #tpu.memory_space<vmem>>) attributes {dimension_semantics = [#tpu.dimension_semantics<parallel>, #tpu.dimension_semantics<arbitrary>], iteration_bounds = array<i64: 2, 1>, scalar_prefetch = 0 : i64, scratch_operands = 0 : i64, tpu.core_type = #tpu.core_type<tc>, window_params = [{transform_indices = @transform_0, window_bounds = array<i64: 16, 128>}, {transform_indices = @transform_1, window_bounds = array<i64: 16, 128>}, {transform_indices = @transform_2, window_bounds = array<i64: 6, 16, 128>}]} {
    %c0_i32 = arith.constant 0 : i32
    %0 = arith.cmpi eq, %arg1, %c0_i32 : i32
    %1 = arith.extui %0 : i1 to i32
    %c0_i32_0 = arith.constant 0 : i32
    %2 = arith.cmpi ne, %1, %c0_i32_0 : i32
    scf.if %2 {
      %cst_47 = arith.constant 0.000000e+00 : f32
      %81 = vector.broadcast %cst_47 : f32 to vector<6x16x128xf32>
      %c0_48 = arith.constant 0 : index
      %c0_49 = arith.constant 0 : index
      %c0_50 = arith.constant 0 : index
      %82 = vector.load %arg4[%c0_48, %c0_49, %c0_50] : memref<6x16x128xf32, #tpu.memory_space<vmem>>, vector<6x16x128xf32>
      tpu.vector_store %arg4[%c0_48, %c0_49, %c0_50], %81 {strides = array<i32>} : memref<6x16x128xf32, #tpu.memory_space<vmem>>, vector<6x16x128xf32>,
    } else {
    }
    %cst = arith.constant 0.000000e+00 : f32
    %3 = vector.broadcast %cst : f32 to vector<16x128xf32>
    %cst_1 = arith.constant 0.000000e+00 : f32
    %4 = vector.broadcast %cst_1 : f32 to vector<16x128xf32>
    %cst_2 = arith.constant 0.000000e+00 : f32
    %5 = vector.broadcast %cst_2 : f32 to vector<16x128xf32>
    %cst_3 = arith.constant 0.000000e+00 : f32
    %6 = vector.broadcast %cst_3 : f32 to vector<16x128xf32>
    %cst_4 = arith.constant 0.000000e+00 : f32
    %7 = vector.broadcast %cst_4 : f32 to vector<16x128xf32>
    %cst_5 = arith.constant 0.000000e+00 : f32
    %8 = vector.broadcast %cst_5 : f32 to vector<16x128xf32>
    %c0_i32_6 = arith.constant 0 : i32
    %c16_i32 = arith.constant 16 : i32
    %9 = arith.muli %c0_i32_6, %c16_i32 : i32
    %10 = tpu.assume_multiple %9, 16 : i32
    %11 = arith.index_cast %10 : i32 to index
    %c0 = arith.constant 0 : index
    %12 = vector.load %arg2[%11, %c0] : memref<16x128xf32, #tpu.memory_space<vmem>>, vector<16x128xf32>
    %13 = arith.index_cast %10 : i32 to index
    %c0_7 = arith.constant 0 : index
    %14 = vector.load %arg3[%13, %c0_7] : memref<16x128xi32, #tpu.memory_space<vmem>>, vector<16x128xi32>
    %c0_i32_8 = arith.constant 0 : i32
    %15 = vector.broadcast %c0_i32_8 : i32 to vector<16x128xi32>
    %16 = arith.cmpi eq, %14, %15 : vector<16x128xi32>
    %cst_9 = arith.constant 0.000000e+00 : f32
    %17 = vector.broadcast %cst_9 : f32 to vector<16x128xf32>
    %18 = arith.select %16, %12, %17 : vector<16x128xi1>, vector<16x128xf32>
    %19 = arith.addf %3, %18 : vector<16x128xf32>
    %c1_i32 = arith.constant 1 : i32
    %20 = vector.broadcast %c1_i32 : i32 to vector<16x128xi32>
    %21 = arith.cmpi eq, %14, %20 : vector<16x128xi32>
    %cst_10 = arith.constant 0.000000e+00 : f32
    %22 = vector.broadcast %cst_10 : f32 to vector<16x128xf32>
    %23 = arith.select %21, %12, %22 : vector<16x128xi1>, vector<16x128xf32>
    %24 = arith.addf %4, %23 : vector<16x128xf32>
    %c2_i32 = arith.constant 2 : i32
    %25 = vector.broadcast %c2_i32 : i32 to vector<16x128xi32>
    %26 = arith.cmpi eq, %14, %25 : vector<16x128xi32>
    %cst_11 = arith.constant 0.000000e+00 : f32
    %27 = vector.broadcast %cst_11 : f32 to vector<16x128xf32>
    %28 = arith.select %26, %12, %27 : vector<16x128xi1>, vector<16x128xf32>
    %29 = arith.addf %5, %28 : vector<16x128xf32>
    %c3_i32 = arith.constant 3 : i32
    %30 = vector.broadcast %c3_i32 : i32 to vector<16x128xi32>
    %31 = arith.cmpi eq, %14, %30 : vector<16x128xi32>
    %cst_12 = arith.constant 0.000000e+00 : f32
    %32 = vector.broadcast %cst_12 : f32 to vector<16x128xf32>
    %33 = arith.select %31, %12, %32 : vector<16x128xi1>, vector<16x128xf32>
    %34 = arith.addf %6, %33 : vector<16x128xf32>
    %c4_i32 = arith.constant 4 : i32
    %35 = vector.broadcast %c4_i32 : i32 to vector<16x128xi32>
    %36 = arith.cmpi eq, %14, %35 : vector<16x128xi32>
    %cst_13 = arith.constant 0.000000e+00 : f32
    %37 = vector.broadcast %cst_13 : f32 to vector<16x128xf32>
    %38 = arith.select %36, %12, %37 : vector<16x128xi1>, vector<16x128xf32>
    %39 = arith.addf %7, %38 : vector<16x128xf32>
    %c5_i32 = arith.constant 5 : i32
    %40 = vector.broadcast %c5_i32 : i32 to vector<16x128xi32>
    %41 = arith.cmpi eq, %14, %40 : vector<16x128xi32>
    %cst_14 = arith.constant 0.000000e+00 : f32
    %42 = vector.broadcast %cst_14 : f32 to vector<16x128xf32>
    %43 = arith.select %41, %12, %42 : vector<16x128xi1>, vector<16x128xf32>
    %44 = arith.addf %8, %43 : vector<16x128xf32>
    %c1_i32_15 = arith.constant 1 : i32
    %c0_16 = arith.constant 0 : index
    %c0_17 = arith.constant 0 : index
    %c0_18 = arith.constant 0 : index
    %45 = vector.load %arg4[%c0_16, %c0_17, %c0_18] : memref<6x16x128xf32, #tpu.memory_space<vmem>>, vector<1x16x128xf32>
    %46 = vector.shape_cast %45 : vector<1x16x128xf32> to vector<16x128xf32>
    %47 = arith.addf %46, %19 : vector<16x128xf32>
    %c0_19 = arith.constant 0 : index
    %c0_20 = arith.constant 0 : index
    %c0_21 = arith.constant 0 : index
    %48 = vector.load %arg4[%c0_19, %c0_20, %c0_21] : memref<6x16x128xf32, #tpu.memory_space<vmem>>, vector<1x16x128xf32>
    %49 = vector.shape_cast %48 : vector<1x16x128xf32> to vector<16x128xf32>
    %50 = vector.shape_cast %47 : vector<16x128xf32> to vector<1x16x128xf32>
    tpu.vector_store %arg4[%c0_19, %c0_20, %c0_21], %50 {strides = array<i32>} : memref<6x16x128xf32, #tpu.memory_space<vmem>>, vector<1x16x128xf32>,
    %c1 = arith.constant 1 : index
    %c0_22 = arith.constant 0 : index
    %c0_23 = arith.constant 0 : index
    %51 = vector.load %arg4[%c1, %c0_22, %c0_23] : memref<6x16x128xf32, #tpu.memory_space<vmem>>, vector<1x16x128xf32>
    %52 = vector.shape_cast %51 : vector<1x16x128xf32> to vector<16x128xf32>
    %53 = arith.addf %52, %24 : vector<16x128xf32>
    %c1_24 = arith.constant 1 : index
    %c0_25 = arith.constant 0 : index
    %c0_26 = arith.constant 0 : index
    %54 = vector.load %arg4[%c1_24, %c0_25, %c0_26] : memref<6x16x128xf32, #tpu.memory_space<vmem>>, vector<1x16x128xf32>
    %55 = vector.shape_cast %54 : vector<1x16x128xf32> to vector<16x128xf32>
    %56 = vector.shape_cast %53 : vector<16x128xf32> to vector<1x16x128xf32>
    tpu.vector_store %arg4[%c1_24, %c0_25, %c0_26], %56 {strides = array<i32>} : memref<6x16x128xf32, #tpu.memory_space<vmem>>, vector<1x16x128xf32>,
    %c2 = arith.constant 2 : index
    %c0_27 = arith.constant 0 : index
    %c0_28 = arith.constant 0 : index
    %57 = vector.load %arg4[%c2, %c0_27, %c0_28] : memref<6x16x128xf32, #tpu.memory_space<vmem>>, vector<1x16x128xf32>
    %58 = vector.shape_cast %57 : vector<1x16x128xf32> to vector<16x128xf32>
    %59 = arith.addf %58, %29 : vector<16x128xf32>
    %c2_29 = arith.constant 2 : index
    %c0_30 = arith.constant 0 : index
    %c0_31 = arith.constant 0 : index
    %60 = vector.load %arg4[%c2_29, %c0_30, %c0_31] : memref<6x16x128xf32, #tpu.memory_space<vmem>>, vector<1x16x128xf32>
    %61 = vector.shape_cast %60 : vector<1x16x128xf32> to vector<16x128xf32>
    %62 = vector.shape_cast %59 : vector<16x128xf32> to vector<1x16x128xf32>
    tpu.vector_store %arg4[%c2_29, %c0_30, %c0_31], %62 {strides = array<i32>} : memref<6x16x128xf32, #tpu.memory_space<vmem>>, vector<1x16x128xf32>,
    %c3 = arith.constant 3 : index
    %c0_32 = arith.constant 0 : index
    %c0_33 = arith.constant 0 : index
    %63 = vector.load %arg4[%c3, %c0_32, %c0_33] : memref<6x16x128xf32, #tpu.memory_space<vmem>>, vector<1x16x128xf32>
    %64 = vector.shape_cast %63 : vector<1x16x128xf32> to vector<16x128xf32>
    %65 = arith.addf %64, %34 : vector<16x128xf32>
    %c3_34 = arith.constant 3 : index
    %c0_35 = arith.constant 0 : index
    %c0_36 = arith.constant 0 : index
    %66 = vector.load %arg4[%c3_34, %c0_35, %c0_36] : memref<6x16x128xf32, #tpu.memory_space<vmem>>, vector<1x16x128xf32>
    %67 = vector.shape_cast %66 : vector<1x16x128xf32> to vector<16x128xf32>
    %68 = vector.shape_cast %65 : vector<16x128xf32> to vector<1x16x128xf32>
    tpu.vector_store %arg4[%c3_34, %c0_35, %c0_36], %68 {strides = array<i32>} : memref<6x16x128xf32, #tpu.memory_space<vmem>>, vector<1x16x128xf32>,
    %c4 = arith.constant 4 : index
    %c0_37 = arith.constant 0 : index
    %c0_38 = arith.constant 0 : index
    %69 = vector.load %arg4[%c4, %c0_37, %c0_38] : memref<6x16x128xf32, #tpu.memory_space<vmem>>, vector<1x16x128xf32>
    %70 = vector.shape_cast %69 : vector<1x16x128xf32> to vector<16x128xf32>
    %71 = arith.addf %70, %39 : vector<16x128xf32>
    %c4_39 = arith.constant 4 : index
    %c0_40 = arith.constant 0 : index
    %c0_41 = arith.constant 0 : index
    %72 = vector.load %arg4[%c4_39, %c0_40, %c0_41] : memref<6x16x128xf32, #tpu.memory_space<vmem>>, vector<1x16x128xf32>
    %73 = vector.shape_cast %72 : vector<1x16x128xf32> to vector<16x128xf32>
    %74 = vector.shape_cast %71 : vector<16x128xf32> to vector<1x16x128xf32>
    tpu.vector_store %arg4[%c4_39, %c0_40, %c0_41], %74 {strides = array<i32>} : memref<6x16x128xf32, #tpu.memory_space<vmem>>, vector<1x16x128xf32>,
    %c5 = arith.constant 5 : index
    %c0_42 = arith.constant 0 : index
    %c0_43 = arith.constant 0 : index
    %75 = vector.load %arg4[%c5, %c0_42, %c0_43] : memref<6x16x128xf32, #tpu.memory_space<vmem>>, vector<1x16x128xf32>
    %76 = vector.shape_cast %75 : vector<1x16x128xf32> to vector<16x128xf32>
    %77 = arith.addf %76, %44 : vector<16x128xf32>
    %c5_44 = arith.constant 5 : index
    %c0_45 = arith.constant 0 : index
    %c0_46 = arith.constant 0 : index
    %78 = vector.load %arg4[%c5_44, %c0_45, %c0_46] : memref<6x16x128xf32, #tpu.memory_space<vmem>>, vector<1x16x128xf32>
    %79 = vector.shape_cast %78 : vector<1x16x128xf32> to vector<16x128xf32>
    %80 = vector.shape_cast %77 : vector<16x128xf32> to vector<1x16x128xf32>
    tpu.vector_store %arg4[%c5_44, %c0_45, %c0_46], %80 {strides = array<i32>} : memref<6x16x128xf32, #tpu.memory_space<vmem>>, vector<1x16x128xf32>,
    return
  }
  func.func @transform_0(%arg0: i32, %arg1: i32) -> (i32, i32) {
    %c1_i32 = arith.constant 1 : i32
    %0 = arith.muli %arg0, %c1_i32 : i32
    %1 = arith.addi %0, %arg1 : i32
    %c0_i32 = arith.constant 0 : i32
    %c0_i32_0 = arith.constant 0 : i32
    return %1, %c0_i32 : i32, i32
  }
  func.func @transform_1(%arg0: i32, %arg1: i32) -> (i32, i32) {
    %c1_i32 = arith.constant 1 : i32
    %0 = arith.muli %arg0, %c1_i32 : i32
    %1 = arith.addi %0, %arg1 : i32
    %c0_i32 = arith.constant 0 : i32
    %c0_i32_0 = arith.constant 0 : i32
    return %1, %c0_i32 : i32, i32
  }
  func.func @transform_2(%arg0: i32, %arg1: i32) -> (i32, i32, i32) {
    %c0_i32 = arith.constant 0 : i32
    %c0_i32_0 = arith.constant 0 : i32
    %c0_i32_1 = arith.constant 0 : i32
    return %arg0, %c0_i32, %c0_i32_0 : i32, i32, i32
  }
}

</mosaic_0001>

<bundles_post_ra>
// kernel: length_loss.1
= control target key start
LH: loop header
LB: loop body
LE: loop exit
PB: predicated region body
PF: predicated region fallthrough
CT: control target
= control target key end

     0   :  { %s471_s9 = smov 0   ;;  %s473_s10 = smov 0   ;;  %s521_s0 = inlined_call_operand.vmem [shape: f32[32,128], index: 0, kind: input, shape index: {}]   ;;  %s522_s1 = inlined_call_operand.vmem [shape: s32[32,128], index: 1, kind: input, shape index: {}]   ;;  %s523_s2 = inlined_call_operand.vmem [shape: f32[12,16,128], index: 2, kind: output, shape index: {}]  }
   0x1   :  { %s475_s11 = smov 0  }
   0x2 LB: > { %s24_s12 = sadd.s32 1, %s450_s10  ;;  %p377_p0 = scmp.ge.s32.totalorder %s454_s11, 1  ;;  %s454_s11 = sphi %s475_s11, %s12_s11   ;;  %s450_s10 = sphi %s473_s10, %s525_s10   ;;  %s446_s9 = sphi %s471_s9, %s524_s9  }
   0x3   : > { %p26_p1 = scmp.ge.s32.totalorder %s24_s12, 2  ;;  %p144_p2 = scmp.lt.s32.totalorder %s454_s11, 3 }
   0x5   : > { %s527_s12 = smov (%p26_p1, %s24_s12), 0  ;;  %p145_p3 = pnand %p377_p0, %p144_p2 }
   0x6   : > { %s190_s13 = smul.u32 (!%p145_p3), 6, %s446_s9  ;;  %s378_s14 = sshll.u32 (!%p145_p3), %s446_s9, 1 }
   0x7   : > { %148 = sbr.rel (%p145_p3) target bundleno = 31 (0x1f), region = 28  ;;  %p176_p4 = scmp.lt.s32.totalorder (!%p145_p3), %s378_s14, 3 }
   0x8   : > { %p191_p5 = scmp.lt.s32.totalorder (!%p145_p3), %s190_s13, 11 }
   0xc   : > { %s529_s14 = smov (!%p176_p4, %s378_s14), 3  ;;  %s531_s13 = smov (!%p191_p5, %s190_s13), 11 }
   0xd   : > { %s379_s15 = sshll.u32 %s529_s14, 3  ;;  %s406_s19 = sshll.u32 %s531_s13, 4 }
   0xe   : > { %s179_s18 = scalar_lea.vmem %s521_s0, %s379_s15  ;;  %s187_s22 = scalar_lea.vmem %s522_s1, %s379_s15 }
   0xf   : > { %v213_v0 = vld [vmem:[%s179_s18] sm:$0xff]  ;;  %v214_v1 = vld [vmem:[%s179_s18 + $0x8] sm:$0xff]  ;;  %s498_s25 = scalar_lea.vmem %s523_s2, %s406_s19 }
  0x10   : > { %v215_v2 = vld [vmem:[%s187_s22] sm:$0xff]  ;;  %v216_v3 = vld [vmem:[%s187_s22 + $0x8] sm:$0xff] }
  0x11   : > { %vm217_vm0 = vcmp.eq.s32.totalorder %v215_v2, 0  ;;  %vm218_vm1 = vcmp.eq.s32.totalorder %v216_v3, 0  ;;  %vm223_vm2 = vcmp.eq.s32.totalorder %v215_v2, 1  ;;  %vm224_vm3 = vcmp.eq.s32.totalorder %v216_v3, 1 }
  0x12   : > { %v219_v4 = vsel %vm217_vm0, %v213_v0, 0.0  ;;  %v220_v5 = vsel %vm218_vm1, %v214_v1, 0.0  ;;  %v225_v6 = vsel %vm223_vm2, %v213_v0, 0.0  ;;  %v226_v7 = vsel %vm224_vm3, %v214_v1, 0.0 }
  0x13   : > { %vm229_vm4 = vcmp.eq.s32.totalorder %v215_v2, 2  ;;  %vm230_vm5 = vcmp.eq.s32.totalorder %v216_v3, 2  ;;  %vm235_vm6 = vcmp.eq.s32.totalorder %v215_v2, 3  ;;  %vm236_vm7 = vcmp.eq.s32.totalorder %v216_v3, 3  ;;  %257 = vst [vmem:[%s498_s25] sm:$0xff] %v219_v4 }
  0x14   : > { %v231_v8 = vsel %vm229_vm4, %v213_v0, 0.0  ;;  %v232_v9 = vsel %vm230_vm5, %v214_v1, 0.0  ;;  %v237_v10 = vsel %vm235_vm6, %v213_v0, 0.0  ;;  %v238_v11 = vsel %vm236_vm7, %v214_v1, 0.0  ;;  %258 = vst [vmem:[%s498_s25 + $0x8] sm:$0xff] %v220_v5 }
  0x15   : > { %386 = vst [vmem:[%s498_s25 + $0x10] sm:$0xff] %v225_v6  ;;  %vm241_vm8 = vcmp.eq.s32.totalorder %v215_v2, 4  ;;  %vm242_vm9 = vcmp.eq.s32.totalorder %v216_v3, 4  ;;  %vm247_vm10 = vcmp.eq.s32.totalorder %v215_v2, 5  ;;  %vm248_vm11 = vcmp.eq.s32.totalorder %v216_v3, 5 }
  0x16   : > { %387 = vst [vmem:[%s498_s25 + $0x18] sm:$0xff] %v226_v7  ;;  %v243_v12 = vsel %vm241_vm8, %v213_v0, 0.0  ;;  %v244_v13 = vsel %vm242_vm9, %v214_v1, 0.0  ;;  %v249_v14 = vsel %vm247_vm10, %v213_v0, 0.0  ;;  %v250_v15 = vsel %vm248_vm11, %v214_v1, 0.0 }
  0x17   : > { %390 = vst [vmem:[%s498_s25 + $0x20] sm:$0xff] %v231_v8 }
  0x18   : > { %391 = vst [vmem:[%s498_s25 + $0x28] sm:$0xff] %v232_v9 }
  0x19   : > { %394 = vst [vmem:[%s498_s25 + $0x30] sm:$0xff] %v237_v10 }
  0x1a   : > { %395 = vst [vmem:[%s498_s25 + $0x38] sm:$0xff] %v238_v11 }
  0x1b   : > { %398 = vst [vmem:[%s498_s25 + $0x40] sm:$0xff] %v243_v12 }
  0x1c   : > { %399 = vst [vmem:[%s498_s25 + $0x48] sm:$0xff] %v244_v13 }
  0x1d   : > { %402 = vst [vmem:[%s498_s25 + $0x50] sm:$0xff] %v249_v14 }
  0x1e   : > { %403 = vst [vmem:[%s498_s25 + $0x58] sm:$0xff] %v250_v15 }
  0x1f PF: > { %s12_s11 = sadd.s32 1, %s454_s11   ;;  %s524_s9 = smov %s450_s10 }
  0x20   : > { %p9_p6 = scmp.ge.s32.totalorder %s12_s11, 4   ;;  %s525_s10 = smov %s527_s12 }
  0x22   :  { %11 = sbr.rel (!%p9_p6) target bundleno = 2 (0x2), region = 70 }

</bundles_post_ra>
